<compile_context>
chip_gen: v5e
topology: v5e:2x2
jax: 0.10.0
libtpu: 0.0.40
codegen_flags: <defaults>
</compile_context>

<pallas_src>
import math

import jax
import jax.numpy as jnp
from jax.experimental import pallas as pl
from jax.experimental.pallas import tpu as pltpu


def _round_up(x, m):
    return (x + m - 1) // m * m


def _make_elman_kernel(t_c, bp, param_dtype):
    """Build the chunked Elman-RNN kernel (closure over static tile sizes)."""

    def kernel(x_ref, h0_ref, w_ih_ref, w_hh_ref, b_ref, out_ref,
               h_scratch, xw_scratch):
        c = pl.program_id(0)

        # Load the initial hidden state into the persistent carry on chunk 0.
        @pl.when(c == 0)
        def _():
            h_scratch[...] = h0_ref[...]

        # ---- Amortized part: input projection + bias for the WHOLE chunk ----
        # (t_c*bp, F) @ (F, Hp) in a single MXU call, fp32 accumulation.
        xw = jnp.dot(x_ref[...].astype(param_dtype), w_ih_ref[...],
                     preferred_element_type=jnp.float32)
        # Bias broadcast happens once per chunk (not once per timestep).
        xw_scratch[...] = xw + b_ref[...]

        # ---- Serial part: only the (bp, Hp) @ (Hp, Hp) recurrence per step ----
        def step(tt, h_prev):
            row = pl.multiple_of(tt * bp, bp)
            rec = jnp.dot(h_prev.astype(param_dtype), w_hh_ref[...],
                          preferred_element_type=jnp.float32)
            h_new = jnp.tanh(xw_scratch[pl.ds(row, bp), :] + rec)  # fp32 tanh
            out_ref[pl.ds(row, bp), :] = h_new.astype(out_ref.dtype)
            return h_new

        h_last = jax.lax.fori_loop(0, t_c, step, h_scratch[...], unroll=True)
        h_scratch[...] = h_last  # carry to the next chunk

    return kernel


def elman_rnn(x_in, w_ih, w_hh, b_ih, b_hh, initial_hidden=None, *,
              batch_first=False, time_chunk=32, param_dtype=jnp.bfloat16):
    """Pallas Elman RNN forward.

    x_in: (B, S, F) if batch_first else (S, B, F)
    w_ih: (H, F), w_hh: (H, H), b_ih/b_hh: (H,)   (PyTorch RNNCell conventions)
    Returns hidden states at every step, same leading-axis layout, last dim H.
    """
    if batch_first:
        x_in = jnp.transpose(x_in, (1, 0, 2))          # -> (S, B, F)
    S, B, F = x_in.shape
    H = w_ih.shape[0]
    out_dtype = x_in.dtype

    # Padded tile sizes: lane-dense hidden dim, full-sublane batch dim.
    hp = _round_up(H, 128)
    bp = _round_up(B, 8)
    t_c = max(1, min(time_chunk, S))
    s_pad = _round_up(S, t_c)
    n_chunks = s_pad // t_c

    # Zero-pad batch / time and flatten to a time-major 2-D slab (free reshape).
    x = x_in
    if bp != B or s_pad != S:
        x = jnp.pad(x, ((0, s_pad - S), (0, bp - B), (0, 0)))
    x2d = x.reshape(s_pad * bp, F)

    # Initial hidden state, fp32, padded.  Padded hidden columns stay exactly 0
    # because the padded weight rows/cols and bias entries are 0.
    h0 = jnp.zeros((bp, hp), jnp.float32)
    if initial_hidden is not None:
        h0 = h0.at[:B, :H].set(jnp.asarray(initial_hidden, jnp.float32))

    # Weights: pre-transposed, zero-padded to Hp, cast to bf16 (fp32 accumulate
    # happens in the kernel).  Biases are folded together and kept fp32.
    w_ih_t = jnp.zeros((F, hp), param_dtype).at[:, :H].set(
        jnp.asarray(w_ih).astype(param_dtype).T)
    w_hh_t = jnp.zeros((hp, hp), param_dtype).at[:H, :H].set(
        jnp.asarray(w_hh).astype(param_dtype).T)
    b = jnp.zeros((1, hp), jnp.float32).at[0, :H].set(
        jnp.asarray(b_ih, jnp.float32) + jnp.asarray(b_hh, jnp.float32))

    # Explicit VMEM budget (double-buffered pipeline blocks + weights + scratch),
    # with headroom — re-derived so it also fits v7x's 64 MiB physical VMEM.
    isz = lambda dt: jnp.dtype(dt).itemsize
    vmem_bytes = (
        2 * t_c * bp * F * isz(x2d.dtype)              # x blocks
        + 2 * t_c * bp * hp * isz(out_dtype)           # out blocks
        + 2 * (F * hp + hp * hp) * isz(param_dtype)    # weight blocks
        + 2 * (bp * hp + hp) * 4                       # h0 + bias blocks
        + (bp * hp + t_c * bp * hp) * 4                # scratch (carry + chunk proj)
    )
    vmem_limit = min(int(2 * vmem_bytes) + (8 << 20), 96 << 20)

    kernel = _make_elman_kernel(t_c, bp, param_dtype)

    out2d = pl.pallas_call(
        kernel,
        out_shape=jax.ShapeDtypeStruct((s_pad * bp, hp), out_dtype),
        grid_spec=pltpu.PrefetchScalarGridSpec(
            num_scalar_prefetch=0,
            grid=(n_chunks,),
            in_specs=[
                pl.BlockSpec((t_c * bp, F), lambda c: (c, 0)),   # x chunk
                pl.BlockSpec((bp, hp), lambda c: (0, 0)),        # h0 (grid-invariant)
                pl.BlockSpec((F, hp), lambda c: (0, 0)),         # W_ih^T (padded, bf16)
                pl.BlockSpec((hp, hp), lambda c: (0, 0)),        # W_hh^T (padded, bf16)
                pl.BlockSpec((1, hp), lambda c: (0, 0)),         # bias (fp32)
            ],
            out_specs=pl.BlockSpec((t_c * bp, hp), lambda c: (c, 0)),
            scratch_shapes=[
                pltpu.VMEM((bp, hp), jnp.float32),           # hidden-state carry
                pltpu.VMEM((t_c * bp, hp), jnp.float32),     # chunk input projection
            ],
        ),
        compiler_params=pltpu.CompilerParams(
            dimension_semantics=("arbitrary",),   # recurrence is sequential in time
            vmem_limit_bytes=vmem_limit,
        ),
    )(x2d, h0, w_ih_t, w_hh_t, b)

    out = out2d.reshape(s_pad, bp, hp)[:S, :B, :H]
    if batch_first:
        out = jnp.transpose(out, (1, 0, 2))        # -> (B, S, H)
    return out


def _elman_ref(x_in, w_ih, w_hh, b_ih, b_hh, h0, *, batch_first=False,
               param_dtype=jnp.float32):
    """Pure-JAX reference (lax.scan) mirroring the kernel's compute recipe:
    operands rounded to `param_dtype`, fp32 accumulation, fp32 carry & tanh."""
    if batch_first:
        x_in = jnp.transpose(x_in, (1, 0, 2))
    wi_t = jnp.asarray(w_ih).astype(param_dtype).T
    wh_t = jnp.asarray(w_hh).astype(param_dtype).T
    b = (jnp.asarray(b_ih, jnp.float32) + jnp.asarray(b_hh, jnp.float32))

    def step(h, x_t):
        pre = (jnp.dot(x_t.astype(param_dtype), wi_t,
                       preferred_element_type=jnp.float32)
               + jnp.dot(h.astype(param_dtype), wh_t,
                         preferred_element_type=jnp.float32)
               + b)
        h_new = jnp.tanh(pre)
        return h_new, h_new

    _, hs = jax.lax.scan(step, jnp.asarray(h0, jnp.float32), x_in)
    hs = hs.astype(x_in.dtype)
    if batch_first:
        hs = jnp.transpose(hs, (1, 0, 2))
    return hs


if __name__ == "__main__":
    # Small shapes implied by the forward: seq=8, batch=4, feature=16, hidden=32.
    S, B, F, H = 8, 4, 16, 32
    batch_first = True

    key = jax.random.PRNGKey(0)
    kx, k1, k2, k3, k4 = jax.random.split(key, 5)

    # PyTorch RNNCell-style shapes and U(-1/sqrt(H), 1/sqrt(H)) init.
    bound = 1.0 / math.sqrt(H)
    w_ih = jax.random.uniform(k1, (H, F), jnp.float32, -bound, bound)
    w_hh = jax.random.uniform(k2, (H, H), jnp.float32, -bound, bound)
    b_ih = jax.random.uniform(k3, (H,), jnp.float32, -bound, bound)
    b_hh = jax.random.uniform(k4, (H,), jnp.float32, -bound, bound)

    x = jax.random.normal(kx, (B, S, F), jnp.float32)   # batch_first layout

    # time_chunk=4 so the tiny demo sequence still exercises the cross-chunk
    # hidden-state carry (real sequences: use 16-64).
    out = elman_rnn(x, w_ih, w_hh, b_ih, b_hh,
                    batch_first=batch_first, time_chunk=4)
    out = jax.block_until_ready(out)
    assert out.shape == (B, S, H), out.shape

    h0 = jnp.zeros((B, H), jnp.float32)
    # Tight check against a reference using the same bf16-operand / fp32-acc recipe.
    ref_bf16 = _elman_ref(x, w_ih, w_hh, b_ih, b_hh, h0,
                          batch_first=batch_first, param_dtype=jnp.bfloat16)
    assert jnp.allclose(out, ref_bf16, atol=2e-3, rtol=2e-3), "mismatch vs bf16 ref"
    # Loose sanity check against full-fp32 math (module semantics).
    ref_f32 = _elman_ref(x, w_ih, w_hh, b_ih, b_hh, h0,
                         batch_first=batch_first, param_dtype=jnp.float32)
    assert jnp.allclose(out, ref_f32, atol=5e-2, rtol=5e-2), "mismatch vs fp32 ref"

    print("KERNEL_OK")
</pallas_src>

<mosaic_0001>
module attributes {stable_mosaic.version = 11 : i64} {
  func.func @kernel(%arg0: i32, %arg1: memref<32x16xf32, #tpu.memory_space<vmem>>, %arg2: memref<8x128xf32, #tpu.memory_space<vmem>>, %arg3: memref<16x128xbf16, #tpu.memory_space<vmem>>, %arg4: memref<128x128xbf16, #tpu.memory_space<vmem>>, %arg5: memref<1x128xf32, #tpu.memory_space<vmem>>, %arg6: memref<32x128xf32, #tpu.memory_space<vmem>>, %arg7: memref<8x128xf32, #tpu.memory_space<vmem>>, %arg8: memref<32x128xf32, #tpu.memory_space<vmem>>) attributes {dimension_semantics = [#tpu.dimension_semantics<arbitrary>], iteration_bounds = array<i64: 2>, scalar_prefetch = 0 : i64, scratch_operands = 2 : i64, tpu.core_type = #tpu.core_type<tc>, window_params = [{transform_indices = @transform_0, window_bounds = array<i64: 32, 16>}, {pipeline_mode = #tpu.pipeline_mode<synchronous>, transform_indices = @transform_1, window_bounds = array<i64: 8, 128>}, {pipeline_mode = #tpu.pipeline_mode<synchronous>, transform_indices = @transform_2, window_bounds = array<i64: 16, 128>}, {pipeline_mode = #tpu.pipeline_mode<synchronous>, transform_indices = @transform_3, window_bounds = array<i64: 128, 128>}, {pipeline_mode = #tpu.pipeline_mode<synchronous>, transform_indices = @transform_4, window_bounds = array<i64: 1, 128>}, {transform_indices = @transform_5, window_bounds = array<i64: 32, 128>}]} {
    %c0_i32 = arith.constant 0 : i32
    %0 = arith.cmpi eq, %arg0, %c0_i32 : i32
    %1 = arith.extui %0 : i1 to i32
    %c0_i32_0 = arith.constant 0 : i32
    %2 = arith.cmpi ne, %1, %c0_i32_0 : i32
    scf.if %2 {
      %c0_36 = arith.constant 0 : index
      %c0_37 = arith.constant 0 : index
      %57 = vector.load %arg2[%c0_36, %c0_37] : memref<8x128xf32, #tpu.memory_space<vmem>>, vector<8x128xf32>
      %c0_38 = arith.constant 0 : index
      %c0_39 = arith.constant 0 : index
      %58 = vector.load %arg7[%c0_38, %c0_39] : memref<8x128xf32, #tpu.memory_space<vmem>>, vector<8x128xf32>
      tpu.vector_store %arg7[%c0_38, %c0_39], %57 {strides = array<i32>} : memref<8x128xf32, #tpu.memory_space<vmem>>, vector<8x128xf32>,
    } else {
    }
    %c0 = arith.constant 0 : index
    %c0_1 = arith.constant 0 : index
    %3 = vector.load %arg1[%c0, %c0_1] : memref<32x16xf32, #tpu.memory_space<vmem>>, vector<32x16xf32>
    %4 = arith.truncf %3 : vector<32x16xf32> to vector<32x16xbf16>
    %c0_2 = arith.constant 0 : index
    %c0_3 = arith.constant 0 : index
    %5 = vector.load %arg3[%c0_2, %c0_3] : memref<16x128xbf16, #tpu.memory_space<vmem>>, vector<16x128xbf16>
    %cst = arith.constant dense<0.000000e+00> : vector<32x128xf32>
    %6 = tpu.matmul %4, %5, %cst {dimension_numbers = #tpu.dot_dimension_numbers<[1], [0], [0], [1], [0, 0, 1, 1], [], []>} : vector<32x16xbf16>, vector<16x128xbf16>, vector<32x128xf32> -> vector<32x128xf32>
    %c0_4 = arith.constant 0 : index
    %c0_5 = arith.constant 0 : index
    %7 = vector.load %arg5[%c0_4, %c0_5] : memref<1x128xf32, #tpu.memory_space<vmem>>, vector<1x128xf32>
    %8 = vector.broadcast %7 : vector<1x128xf32> to vector<32x128xf32>
    %9 = arith.addf %6, %8 : vector<32x128xf32>
    %c0_6 = arith.constant 0 : index
    %c0_7 = arith.constant 0 : index
    %10 = vector.load %arg8[%c0_6, %c0_7] : memref<32x128xf32, #tpu.memory_space<vmem>>, vector<32x128xf32>
    tpu.vector_store %arg8[%c0_6, %c0_7], %9 {strides = array<i32>} : memref<32x128xf32, #tpu.memory_space<vmem>>, vector<32x128xf32>,
    %c0_8 = arith.constant 0 : index
    %c0_9 = arith.constant 0 : index
    %11 = vector.load %arg7[%c0_8, %c0_9] : memref<8x128xf32, #tpu.memory_space<vmem>>, vector<8x128xf32>
    %c0_i32_10 = arith.constant 0 : i32
    %c8_i32 = arith.constant 8 : i32
    %12 = arith.muli %c0_i32_10, %c8_i32 : i32
    %13 = tpu.assume_multiple %12, 8 : i32
    %14 = arith.truncf %11 : vector<8x128xf32> to vector<8x128xbf16>
    %c0_11 = arith.constant 0 : index
    %c0_12 = arith.constant 0 : index
    %15 = vector.load %arg4[%c0_11, %c0_12] : memref<128x128xbf16, #tpu.memory_space<vmem>>, vector<128x128xbf16>
    %cst_13 = arith.constant dense<0.000000e+00> : vector<8x128xf32>
    %16 = tpu.matmul %14, %15, %cst_13 {dimension_numbers = #tpu.dot_dimension_numbers<[1], [0], [0], [1], [0, 0, 1, 1], [], []>} : vector<8x128xbf16>, vector<128x128xbf16>, vector<8x128xf32> -> vector<8x128xf32>
    %17 = arith.index_cast %13 : i32 to index
    %c0_14 = arith.constant 0 : index
    %18 = vector.load %arg8[%17, %c0_14] : memref<32x128xf32, #tpu.memory_space<vmem>>, vector<8x128xf32>
    %19 = arith.addf %18, %16 : vector<8x128xf32>
    %20 = math.tanh %19 : vector<8x128xf32>
    %21 = arith.index_cast %13 : i32 to index
    %c0_15 = arith.constant 0 : index
    %22 = vector.load %arg6[%21, %c0_15] : memref<32x128xf32, #tpu.memory_space<vmem>>, vector<8x128xf32>
    tpu.vector_store %arg6[%21, %c0_15], %20 {strides = array<i32>} : memref<32x128xf32, #tpu.memory_space<vmem>>, vector<8x128xf32>,
    %c1_i32 = arith.constant 1 : i32
    %c8_i32_16 = arith.constant 8 : i32
    %23 = arith.muli %c1_i32, %c8_i32_16 : i32
    %24 = tpu.assume_multiple %23, 8 : i32
    %25 = arith.truncf %20 : vector<8x128xf32> to vector<8x128xbf16>
    %c0_17 = arith.constant 0 : index
    %c0_18 = arith.constant 0 : index
    %26 = vector.load %arg4[%c0_17, %c0_18] : memref<128x128xbf16, #tpu.memory_space<vmem>>, vector<128x128xbf16>
    %cst_19 = arith.constant dense<0.000000e+00> : vector<8x128xf32>
    %27 = tpu.matmul %25, %26, %cst_19 {dimension_numbers = #tpu.dot_dimension_numbers<[1], [0], [0], [1], [0, 0, 1, 1], [], []>} : vector<8x128xbf16>, vector<128x128xbf16>, vector<8x128xf32> -> vector<8x128xf32>
    %28 = arith.index_cast %24 : i32 to index
    %c0_20 = arith.constant 0 : index
    %29 = vector.load %arg8[%28, %c0_20] : memref<32x128xf32, #tpu.memory_space<vmem>>, vector<8x128xf32>
    %30 = arith.addf %29, %27 : vector<8x128xf32>
    %31 = math.tanh %30 : vector<8x128xf32>
    %32 = arith.index_cast %24 : i32 to index
    %c0_21 = arith.constant 0 : index
    %33 = vector.load %arg6[%32, %c0_21] : memref<32x128xf32, #tpu.memory_space<vmem>>, vector<8x128xf32>
    tpu.vector_store %arg6[%32, %c0_21], %31 {strides = array<i32>} : memref<32x128xf32, #tpu.memory_space<vmem>>, vector<8x128xf32>,
    %c2_i32 = arith.constant 2 : i32
    %c8_i32_22 = arith.constant 8 : i32
    %34 = arith.muli %c2_i32, %c8_i32_22 : i32
    %35 = tpu.assume_multiple %34, 8 : i32
    %36 = arith.truncf %31 : vector<8x128xf32> to vector<8x128xbf16>
    %c0_23 = arith.constant 0 : index
    %c0_24 = arith.constant 0 : index
    %37 = vector.load %arg4[%c0_23, %c0_24] : memref<128x128xbf16, #tpu.memory_space<vmem>>, vector<128x128xbf16>
    %cst_25 = arith.constant dense<0.000000e+00> : vector<8x128xf32>
    %38 = tpu.matmul %36, %37, %cst_25 {dimension_numbers = #tpu.dot_dimension_numbers<[1], [0], [0], [1], [0, 0, 1, 1], [], []>} : vector<8x128xbf16>, vector<128x128xbf16>, vector<8x128xf32> -> vector<8x128xf32>
    %39 = arith.index_cast %35 : i32 to index
    %c0_26 = arith.constant 0 : index
    %40 = vector.load %arg8[%39, %c0_26] : memref<32x128xf32, #tpu.memory_space<vmem>>, vector<8x128xf32>
    %41 = arith.addf %40, %38 : vector<8x128xf32>
    %42 = math.tanh %41 : vector<8x128xf32>
    %43 = arith.index_cast %35 : i32 to index
    %c0_27 = arith.constant 0 : index
    %44 = vector.load %arg6[%43, %c0_27] : memref<32x128xf32, #tpu.memory_space<vmem>>, vector<8x128xf32>
    tpu.vector_store %arg6[%43, %c0_27], %42 {strides = array<i32>} : memref<32x128xf32, #tpu.memory_space<vmem>>, vector<8x128xf32>,
    %c3_i32 = arith.constant 3 : i32
    %c8_i32_28 = arith.constant 8 : i32
    %45 = arith.muli %c3_i32, %c8_i32_28 : i32
    %46 = tpu.assume_multiple %45, 8 : i32
    %47 = arith.truncf %42 : vector<8x128xf32> to vector<8x128xbf16>
    %c0_29 = arith.constant 0 : index
    %c0_30 = arith.constant 0 : index
    %48 = vector.load %arg4[%c0_29, %c0_30] : memref<128x128xbf16, #tpu.memory_space<vmem>>, vector<128x128xbf16>
    %cst_31 = arith.constant dense<0.000000e+00> : vector<8x128xf32>
    %49 = tpu.matmul %47, %48, %cst_31 {dimension_numbers = #tpu.dot_dimension_numbers<[1], [0], [0], [1], [0, 0, 1, 1], [], []>} : vector<8x128xbf16>, vector<128x128xbf16>, vector<8x128xf32> -> vector<8x128xf32>
    %50 = arith.index_cast %46 : i32 to index
    %c0_32 = arith.constant 0 : index
    %51 = vector.load %arg8[%50, %c0_32] : memref<32x128xf32, #tpu.memory_space<vmem>>, vector<8x128xf32>
    %52 = arith.addf %51, %49 : vector<8x128xf32>
    %53 = math.tanh %52 : vector<8x128xf32>
    %54 = arith.index_cast %46 : i32 to index
    %c0_33 = arith.constant 0 : index
    %55 = vector.load %arg6[%54, %c0_33] : memref<32x128xf32, #tpu.memory_space<vmem>>, vector<8x128xf32>
    tpu.vector_store %arg6[%54, %c0_33], %53 {strides = array<i32>} : memref<32x128xf32, #tpu.memory_space<vmem>>, vector<8x128xf32>,
    %c4_i32 = arith.constant 4 : i32
    %c0_34 = arith.constant 0 : index
    %c0_35 = arith.constant 0 : index
    %56 = vector.load %arg7[%c0_34, %c0_35] : memref<8x128xf32, #tpu.memory_space<vmem>>, vector<8x128xf32>
    tpu.vector_store %arg7[%c0_34, %c0_35], %53 {strides = array<i32>} : memref<8x128xf32, #tpu.memory_space<vmem>>, vector<8x128xf32>,
    return
  }
  func.func @transform_0(%arg0: i32) -> (i32, i32) {
    %c0_i32 = arith.constant 0 : i32
    %c0_i32_0 = arith.constant 0 : i32
    return %arg0, %c0_i32 : i32, i32
  }
  func.func @transform_1(%arg0: i32) -> (i32, i32) {
    %c0_i32 = arith.constant 0 : i32
    %c0_i32_0 = arith.constant 0 : i32
    %c0_i32_1 = arith.constant 0 : i32
    return %c0_i32, %c0_i32_0 : i32, i32
  }
  func.func @transform_2(%arg0: i32) -> (i32, i32) {
    %c0_i32 = arith.constant 0 : i32
    %c0_i32_0 = arith.constant 0 : i32
    %c0_i32_1 = arith.constant 0 : i32
    return %c0_i32, %c0_i32_0 : i32, i32
  }
  func.func @transform_3(%arg0: i32) -> (i32, i32) {
    %c0_i32 = arith.constant 0 : i32
    %c0_i32_0 = arith.constant 0 : i32
    %c0_i32_1 = arith.constant 0 : i32
    return %c0_i32, %c0_i32_0 : i32, i32
  }
  func.func @transform_4(%arg0: i32) -> (i32, i32) {
    %c0_i32 = arith.constant 0 : i32
    %c0_i32_0 = arith.constant 0 : i32
    %c0_i32_1 = arith.constant 0 : i32
    return %c0_i32, %c0_i32_0 : i32, i32
  }
  func.func @transform_5(%arg0: i32) -> (i32, i32) {
    %c0_i32 = arith.constant 0 : i32
    %c0_i32_0 = arith.constant 0 : i32
    return %arg0, %c0_i32 : i32, i32
  }
}

</mosaic_0001>

<bundles_post_ra>
// kernel: tpu_custom_call.1
= control target key start
LH: loop header
LB: loop body
LE: loop exit
PB: predicated region body
PF: predicated region fallthrough
CT: control target
= control target key end

     0   :  { %10 = vsyncpa [#allocation5], 0  ;;  %s1234_s0 = inlined_call_operand.vmem [shape: f32[64,16], index: 0, kind: input, shape index: {}]   ;;  %s1235_s1 = inlined_call_operand.vmem [shape: f32[8,128], index: 1, kind: input, shape index: {}]   ;;  %s1236_s2 = inlined_call_operand.vmem [shape: bf16[16,128], index: 2, kind: input, shape index: {}]   ;;  %s1237_s3 = inlined_call_operand.vmem [shape: bf16[128,128], index: 3, kind: input, shape index: {}]   ;;  %s1238_s4 = inlined_call_operand.vmem [shape: f32[1,128], index: 4, kind: input, shape index: {}]   ;;  %s1239_s5 = inlined_call_operand.hbm [shape: f32[64,128], index: 5, kind: output, shape index: {}]  }
   0x1   :  { %12 = vsyncpa [#allocation5 + $0x1], 0  ;;  %s1025_s18 = smov 0   ;;  %s1027_s19 = smov 0  }
   0x2   :  { %s1029_s20 = smov 0   ;;  %s1031_s21 = smov 0  }
   0x3 LB: > { %s1046_s22 = sadd.s32 4294967295, %s991_s21   ;;  %s695_s23 = sadd.s32 4294967294, %s991_s21   ;;  %s991_s21 = sphi %s1031_s21, %s1245_s21   ;;  %s987_s20 = sphi %s1029_s20, %s1244_s20   ;;  %s983_s19 = sphi %s1027_s19, %s1243_s19   ;;  %s979_s18 = sphi %s1025_s18, %s1242_s18  }
   0x4   : > { %s1050_s24 = sadd.s32 1, %s991_s21   ;;  %s135_s25 = sadd.s32 1, %s987_s20 }
   0x5   : > { %s132_s26 = ssub.s32 %s991_s21, %s1050_s24  ;;  %p145_p0 = scmp.ne.s32.totalorder %s987_s20, %s983_s19 }
   0x6   : > { %p133_p1 = scmp.eq.s32.totalorder %s132_s26, 0  ;;  %p146_p2 = scmp.eq.s32.totalorder %s1046_s22, 1 }
   0x7   : > { %p151_p3 = scmp.ne.s32.totalorder %s983_s19, %s979_s18  ;;  %p152_p4 = scmp.eq.s32.totalorder %s695_s23, 1 }
   0x8   : > { %s1061_s27 = scalar_select %p133_p1, %s987_s20, %s135_s25  }
   0x9   : > { %p1063_p5 = por %p146_p2, %p145_p0  ;;  %p1067_p6 = por %p152_p4, %p151_p3 }
   0xa   : > { %p698_p7 = scmp.ge.s32.totalorder %s991_s21, 1  ;;  %p191_p8 = scmp.lt.s32.totalorder %s991_s21, 3 }
   0xc   : > { %p192_p9 = pnand %p698_p7, %p191_p8 }
   0xd   : > { %s216_s30 = sand.u32 (!%p192_p9), 1, %s983_s19   ;;  %s700_s6 = sshll.u32 (!%p192_p9), %s1046_s22, 2 }
   0xe   : > { %195 = sbr.rel (%p192_p9) target bundleno = 621 (0x26d), region = 40  ;;  %s699_s7 = sshll.u32 (!%p192_p9), %s216_s30, 5 }
   0xf   : > { %p220_p10 = scmp.lt.s32.totalorder (!%p192_p9), %s700_s6, 7  ;;  %s1082_s12 = scalar_lea.vmem (!%p192_p9), [#allocation4], %s699_s7 }
  0x10   : > { %p702_p11 = scmp.ne.s32.totalorder (!%p192_p9), %s1046_s22, 0 }
  0x13   : > { %s1247_s6 = smov (!%p220_p10, %s700_s6), 7  ;;  %230 = sbr.rel (%p702_p11) target bundleno = 26 (0x1a), region = 44 }
  0x14   : > { %s701_s8 = sshll.u32 %s1247_s6, 3 }
  0x15   : > { %s1080_s11 = scalar_lea.vmem %s1234_s0, %s701_s8 }
  0x18   : > { %v231_v0 = vld [vmem:[%s1235_s1] sm:$0xff] }
  0x19   : > { %232 = vst [vmem:[#allocation2] sm:$0xff] %v231_v0 }
  0x1a PF: > { %v853_v1 = vld [vmem:[%s1237_s3 + $0x38] sm:$0xff]  ;;  %v845_v2 = vld [vmem:[%s1236_s2] sm:$0xff]  ;;  %v852_v3 = vld [vmem:[%s1237_s3 + $0x30] sm:$0xff]  ;;  %vm251_vm0 = vcmask 130048   ;;  %s878_s17 = sshll.u32 %s1046_s22, 5  ;;  %s630_s26 = sshll.u32 %s1082_s12, 4  ;;  %s631_s26 = int_to_ptr.vmem [resolvable:$true] %s630_s26 }
  0x1b   : > { %347 = vmatpush.bf16.msra.mxu1 %v853_v1  ;;  %v233_v4 = vld [vmem:[%s1080_s11] sm:$0xff]  ;;  %v234_v5 = vld [vmem:[%s1080_s11 + $0x8] sm:$0xff]  ;;  %265 = vmatpush.bf16.msra.mxu0 %v845_v2  ;;  %v861_v7 = vld [vmem:[%s1237_s3 + $0x38] sm:$0xff]  ;;  %s629_s25 = scalar_lea.hbm %s1239_s5, %s878_s17  ;;  %s618_s7 = scalar_lea.sflag [#allocation5], %s216_s30 }
  0x1c   : > { %v237_v6 = vpack.c.bf16 %v234_v5, %v233_v4  ;;  %v851_v8 = vld [vmem:[%s1237_s3 + $0x28] sm:$0xff]  ;;  %429 = vmatpush.bf16.msra.mxu2 %v861_v7  ;;  %v860_v9 = vld [vmem:[%s1237_s3 + $0x30] sm:$0xff]  ;;  %v850_v10 = vld [vmem:[%s1237_s3 + $0x20] sm:$0xff]  ;;  %s632_s6 = sshll.u32 %s629_s25, 4  ;;  %s949_s13 = scalar_lea.hbm %s1239_s5, 64  ;;  %s633_s6 = int_to_ptr.hbm [resolvable:$true] %s632_s6 }
  0x1d   : > { %v859_v11 = vld [vmem:[%s1237_s3 + $0x28] sm:$0xff]  ;;  %v849_v12 = vld [vmem:[%s1237_s3 + $0x18] sm:$0xff]  ;;  %v848_v13 = vld [vmem:[%s1237_s3 + $0x10] sm:$0xff]  ;;  %s943_s22 = sshra.s32 %s633_s6, 4  ;;  %s944_s22 = int_to_ptr.hbm [resolvable:$true] %s943_s22 }
  0x1e   : > { %707 = vmatmul.msk.bf16.vlgmr.msra.gmra.mxu0 %vm251_vm0, %v237_v6  ;;  %v847_v14 = vld [vmem:[%s1237_s3 + $0x8] sm:$0xff]  ;;  %v846_v15 = vld [vmem:[%s1237_s3] sm:$0xff]  ;;  %v857_v19 = vld [vmem:[%s1237_s3 + $0x18] sm:$0xff]  ;;  %s945_s8 = scalar_lea.hbm %s944_s22, 32  ;;  %p950_p1 = scmp.lt.s32.totalorder %s944_s22, %s1239_s5 }
  0x1f   : > { %348 = vmatpush.bf16.msra.mxu1 %v852_v3  ;;  %v858_v18 = vld [vmem:[%s1237_s3 + $0x20] sm:$0xff]  ;;  %v856_v20 = vld [vmem:[%s1237_s3 + $0x10] sm:$0xff]  ;;  %v855_v21 = vld [vmem:[%s1237_s3 + $0x8] sm:$0xff]  ;;  %p946_p12 = scmp.ne.s32.totalorder %s944_s22, %s945_s8  ;;  %p951_p2 = scmp.lt.s32.totalorder %s949_s13, %s945_s8 }
  0x20   : > { %430 = vmatpush.bf16.msra.mxu2 %v860_v9  ;;  %v281_v16 = vld [vmem:[#allocation2] sm:$0xff]  ;;  %v869_v23 = vld [vmem:[%s1237_s3 + $0x38] sm:$0xff]  ;;  %v868_v24 = vld [vmem:[%s1237_s3 + $0x30] sm:$0xff] }
  0x21   : > { %v282_v17 = vpack.c.bf16 %v281_v16, %v281_v16  ;;  %v854_v22 = vld [vmem:[%s1237_s3] sm:$0xff]  ;;  %513 = vmatpush.bf16.msra.mxu3 %v869_v23  ;;  %v867_v25 = vld [vmem:[%s1237_s3 + $0x28] sm:$0xff]  ;;  %v865_v28 = vld [vmem:[%s1237_s3 + $0x18] sm:$0xff]  ;;  %p947_p13 = pnand %p946_p12, %p1063_p5  ;;  %p952_p3 = por %p951_p2, %p950_p1 }
  0x22   : > { %v866_v26 = vld [vmem:[%s1237_s3 + $0x20] sm:$0xff]  ;;  %v864_v36 = vld [vmem:[%s1237_s3 + $0x10] sm:$0xff]  ;;  %v863_v37 = vld [vmem:[%s1237_s3 + $0x8] sm:$0xff] }
  0x23   : > { %349 = vmatpush.bf16.msra.mxu1 %v851_v8  ;;  %v920_v27 = vld [vmem:[%s1238_s4] ss:$0 sm:$0xff]  ;;  %v235_v38 = vld [vmem:[%s1080_s11 + $0x10] sm:$0xff]  ;;  %v236_v39 = vld [vmem:[%s1080_s11 + $0x18] sm:$0xff]  ;;  %p948_p0 = pneg %p947_p13 }
  0x24   : > { %431 = vmatpush.bf16.msra.mxu2 %v859_v11  ;;  %v238_v40 = vpack.c.bf16 %v236_v39, %v235_v38  ;;  %v862_v41 = vld [vmem:[%s1237_s3] sm:$0xff]  ;;  %v877_v42 = vld [vmem:[%s1237_s3 + $0x38] sm:$0xff]  ;;  %v876_v43 = vld [vmem:[%s1237_s3 + $0x30] sm:$0xff] }
  0x25   : > { %514 = vmatpush.bf16.msra.mxu3 %v868_v24  ;;  %597 = vmatpush.bf16.msrb.mxu0 %v877_v42  ;;  %v875_v44 = vld [vmem:[%s1237_s3 + $0x28] sm:$0xff]  ;;  %v874_v52 = vld [vmem:[%s1237_s3 + $0x20] sm:$0xff]  ;;  %v873_v53 = vld [vmem:[%s1237_s3 + $0x18] sm:$0xff]  ;;  %p953_p4 = pnand %p952_p3, %p948_p0 }
  0x26   : > { %v872_v54 = vld [vmem:[%s1237_s3 + $0x10] sm:$0xff]  ;;  %v871_v55 = vld [vmem:[%s1237_s3 + $0x8] sm:$0xff]  ;;  %v870_v56 = vld [vmem:[%s1237_s3] sm:$0xff] }
  0x27   : > { %350 = vmatpush.bf16.msra.mxu1 %v850_v10 }
  0x28   : > { %432 = vmatpush.bf16.msra.mxu2 %v858_v18 }
  0x29   : > { %515 = vmatpush.bf16.msra.mxu3 %v867_v25  ;;  %598 = vmatpush.bf16.msrb.mxu0 %v876_v43 }
  0x2b   : > { %351 = vmatpush.bf16.msra.mxu1 %v849_v12 }
  0x2c   : > { %433 = vmatpush.bf16.msra.mxu2 %v857_v19 }
  0x2d   : > { %516 = vmatpush.bf16.msra.mxu3 %v866_v26  ;;  %599 = vmatpush.bf16.msrb.mxu0 %v875_v44 }
  0x2e   : > { %708 = vmatmul.msk.bf16.gmra.mxu0 %vm251_vm0, %v238_v40 }
  0x2f   : > { %352 = vmatpush.bf16.msra.mxu1 %v848_v13 }
  0x30   : > { %434 = vmatpush.bf16.msra.mxu2 %v856_v20 }
  0x31   : > { %517 = vmatpush.bf16.msra.mxu3 %v865_v28  ;;  %600 = vmatpush.bf16.msrb.mxu0 %v874_v52 }
  0x33   : > { %353 = vmatpush.bf16.msra.mxu1 %v847_v14 }
  0x34   : > { %435 = vmatpush.bf16.msra.mxu2 %v855_v21 }
  0x35   : > { %518 = vmatpush.bf16.msra.mxu3 %v864_v36  ;;  %601 = vmatpush.bf16.msrb.mxu0 %v873_v53 }
  0x37   : > { %354 = vmatpush.bf16.msra.mxu1 %v846_v15 }
  0x38   : > { %436 = vmatpush.bf16.msra.mxu2 %v854_v22 }
  0x39   : > { %519 = vmatpush.bf16.msra.mxu3 %v863_v37  ;;  %602 = vmatpush.bf16.msrb.mxu0 %v872_v54 }
  0x3a   : > { %355 = vmatmul.bf16.vlgmr.msra.gmra.mxu1 %v282_v17 }
  0x3d   : > { %520 = vmatpush.bf16.msra.mxu3 %v862_v41  ;;  %603 = vmatpush.bf16.msrb.mxu0 %v871_v55 }
  0x41   : > { %604 = vmatpush.bf16.msrb.mxu0 %v870_v56 }
  0x9b   : > { %v267_v29 = vpop.f32.mrf.mxu0 }
  0x9c   : > { %v268_v30 = vadd.f32 %v920_v27, %v267_v29 }
  0xa3   : > { %v269_v45 = vpop.f32.mrf.mxu0 }
  0xa4   : > { %v270_v46 = vadd.f32 %v920_v27, %v269_v45 }
  0xab   : > { %v272_v57 = vpop.f32.mrf.mxu0 }
  0xac   : > { %v273_v58 = vadd.f32 %v920_v27, %v272_v57 }
  0xb3   : > { %v274_v0 = vpop.f32.mrf.mxu0 }
  0xb4   : > { %v275_v1 = vadd.f32 %v920_v27, %v274_v0 }
  0xb7   : > { %v356_v31 = vpop.f32.mrf.mxu1 }
  0xb8   : > { %v361_v32 = vadd.f32 %v356_v31, %v268_v30 }
  0xba   : > { %921 = vtanh.f32 %v361_v32 }
  0xbf   : > { %v358_v33 = vpop.f32.mrf.mxu1 }
  0xc0   : > { %v922_v34 = vpop.eup %921 }
  0xc1   : > { %363 = vst [vmem:[%s1082_s12] sm:$0xff] %v922_v34  ;;  %v364_v35 = vpack.c.bf16 %v922_v34, %v922_v34 }
  0xc3   : > { %437 = vmatmul.bf16.vlgmr.msra.gmra.mxu2 %v364_v35 }
 0x146   : > { %v438_v47 = vpop.f32.mrf.mxu2 }
 0x147   : > { %v444_v48 = vadd.f32 %v438_v47, %v270_v46 }
 0x149   : > { %923 = vtanh.f32 %v444_v48 }
 0x14e   : > { %v440_v49 = vpop.f32.mrf.mxu2 }
 0x14f   : > { %v924_v50 = vpop.eup %923 }
 0x150   : > { %773 = vst [vmem:[%s1082_s12 + $0x8] sm:$0xff] %v924_v50  ;;  %v448_v51 = vpack.c.bf16 %v924_v50, %v924_v50 }
 0x152   : > { %521 = vmatmul.bf16.vlgmr.msra.gmra.mxu3 %v448_v51 }
 0x1d5   : > { %v522_v59 = vpop.f32.mrf.mxu3 }
 0x1d6   : > { %v528_v60 = vadd.f32 %v522_v59, %v273_v58 }
 0x1d8   : > { %925 = vtanh.f32 %v528_v60 }
 0x1dd   : > { %v524_v61 = vpop.f32.mrf.mxu3 }
 0x1de   : > { %v926_v62 = vpop.eup %925 }
 0x1df   : > { %806 = vst [vmem:[%s1082_s12 + $0x10] sm:$0xff] %v926_v62  ;;  %v532_v63 = vpack.c.bf16 %v926_v62, %v926_v62 }
 0x1e1   : > { %605 = vmatmul.bf16.vlgmr.msrb.gmra.mxu0 %v532_v63 }
 0x25e   : > { %v606_v2 = vpop.f32.mrf.mxu0 }
 0x25f   : > { %v612_v3 = vadd.f32 %v606_v2, %v275_v1 }
 0x261   : > { %927 = vtanh.f32 %v612_v3 }
 0x266   : > { %v608_v4 = vpop.f32.mrf.mxu0 }
 0x267   : > { %v928_v5 = vpop.eup %927 }
 0x268   : > { %839 = vst [vmem:[%s1082_s12 + $0x18] sm:$0xff] %v928_v5 }
 0x269   : > { %616 = vst [vmem:[#allocation2] sm:$0xff] %v928_v5 }
 0x26a   : > { %956 = shalt.err (!%p953_p4)
}
 0x26b   : > { %s993_s30 = smov 128   ;;  %s994_s12 = smov 8  }
 0x26c   : > { %879 = dma.vmem_to_hbm [thread:$0]  (%p1063_p5), %s631_s26, 512, %s633_s6, %s618_s7, %s993_s30, %s993_s30, %s994_s12  }
 0x26d PF: > { %p885_p7 = scmp.ge.s32.totalorder %s991_s21, 2  ;;  %s647_s16 = sand.u32 1, %s979_s18  }
 0x26e   : > { %s648_s17 = scalar_lea.sflag [#allocation5], %s647_s16 }
 0x26f   : > { %p882_p8 = pnand %p885_p7, %p1067_p6 }
 0x271   : > { %p883_p9 = pneg %p882_p8 }
 0x273   : > { %974 = dma.done.wait (%p883_p9), %s648_s17, 512  }
 0x274   : > { %976 = vsyncadd (%p883_p9), %s648_s17, 4294966784  ;;  %p15_p10 = scmp.ge.s32.totalorder %s1050_s24, 4   ;;  %s1242_s18 = smov %s983_s19 }
 0x275   : > { %s1243_s19 = smov %s987_s20  ;;  %s1244_s20 = smov %s1061_s27 }
 0x276   : > { %s1245_s21 = smov %s1050_s24  ;;  %17 = sbr.rel (!%p15_p10) target bundleno = 3 (0x3), region = 85 }
 0x27b   :  { %654 = vsyncpa [#allocation5], 1 }
 0x27c   :  { %656 = vsyncpa [#allocation5 + $0x1], 1 }

</bundles_post_ra>
